<compile_context>
chip_gen: v7x
topology: tpu7x:2x2x1
jax: 0.10.0
libtpu: 0.0.40
codegen_flags: <defaults>
</compile_context>

<pallas_src>
import jax
import jax.numpy as jnp
from jax.experimental import pallas as pl
from jax.experimental.pallas import tpu as pltpu


# ----------------------------------------------------------------------------
# Kernels
# ----------------------------------------------------------------------------
def _linear_bias_kernel(x_ref, w_ref, b_ref, o_ref, acc_ref):
    # x_ref:  (tm, tk)  activation tile
    # w_ref:  (tk, tn)  pre-transposed weight tile (K, N layout)
    # b_ref:  (1, tn)   bias slice
    # o_ref:  (tm, tn)  output tile
    # acc_ref:(tm, tn)  f32 accumulator, persists across the K grid axis
    k = pl.program_id(2)

    @pl.when(k == 0)
    def _():
        # Fold the bias into the accumulator init: removes the finalize add.
        acc_ref[...] = jnp.broadcast_to(
            b_ref[...].astype(jnp.float32), acc_ref.shape)

    acc_ref[...] += jnp.dot(x_ref[...], w_ref[...],
                            preferred_element_type=jnp.float32)

    @pl.when(k == pl.num_programs(2) - 1)
    def _():
        o_ref[...] = acc_ref[...].astype(o_ref.dtype)


def _linear_nobias_kernel(x_ref, w_ref, o_ref, acc_ref):
    k = pl.program_id(2)

    @pl.when(k == 0)
    def _():
        acc_ref[...] = jnp.zeros_like(acc_ref)

    acc_ref[...] += jnp.dot(x_ref[...], w_ref[...],
                            preferred_element_type=jnp.float32)

    @pl.when(k == pl.num_programs(2) - 1)
    def _():
        o_ref[...] = acc_ref[...].astype(o_ref.dtype)


# ----------------------------------------------------------------------------
# Tiling
# ----------------------------------------------------------------------------
_TM_CAP = 256    # output rows per tile    (multiple of 256: fills v6e/v7x MXU)
_TN_CAP = 1024   # output columns per tile (multiple of 128: lane-dense stores)
_TK_CAP = 512    # reduction chunk         (multiple of 128)


def _round_up(a, b):
    return ((a + b - 1) // b) * b


def _pick_tiles(m, k, n):
    # Full-extent blocks are always legal; 128/8-multiple caps keep ragged
    # last blocks legal and stores lane-dense.
    tm = m if m < _TM_CAP else _TM_CAP
    tn = n if n < _TN_CAP else _TN_CAP
    if k <= _TK_CAP:
        tk, k_pad = k, k          # single reduction step, no padding needed
    else:
        tk = _TK_CAP
        k_pad = _round_up(k, tk)  # zero-padded K restores a proper pipeline
    return tm, tn, tk, k_pad


# ----------------------------------------------------------------------------
# Wrapper
# ----------------------------------------------------------------------------
def poincare_ball_linear(x, weight, bias=None, curvature=1.0,
                         use_bf16_matmul=False):
    """x: (..., in_features); weight: (out, in) native torch layout; bias: (out,) or None."""
    del curvature  # unused on the (only reachable) fallback path of the reference

    out_features, in_features = weight.shape
    lead_shape = x.shape[:-1]
    m = 1
    for d in lead_shape:
        m *= d
    out_dtype = x.dtype

    x2d = x.reshape(m, in_features)
    # Pre-transpose once to (K, N): kernel contracts RHS over its leading dim,
    # so no per-tile transpose is ever required inside the grid loop.
    w_t = weight.T

    tm, tn, tk, k_pad = _pick_tiles(m, in_features, out_features)

    if k_pad != in_features:
        pad = k_pad - in_features
        x2d = jnp.pad(x2d, ((0, 0), (0, pad)))
        w_t = jnp.pad(w_t, ((0, pad), (0, 0)))

    if use_bf16_matmul:
        # Numerics-affecting: bf16-native MXU on v6e/v7x, f32 accumulation.
        x2d = x2d.astype(jnp.bfloat16)
        w_t = w_t.astype(jnp.bfloat16)

    grid = (pl.cdiv(m, tm), pl.cdiv(out_features, tn), k_pad // tk)

    # VMEM budget: double-buffered x/w/out tiles + f32 accumulator + bias.
    in_bytes = x2d.dtype.itemsize
    out_bytes = jnp.dtype(out_dtype).itemsize
    footprint = (2 * (tm * tk + tk * tn) * in_bytes
                 + 2 * tm * tn * out_bytes
                 + tm * tn * 4
                 + 2 * tn * 4)
    vmem_limit = max(2 * footprint + (8 << 20), 32 << 20)
    try:
        phys_vmem = pltpu.get_tpu_info().vmem_capacity_bytes
    except Exception:
        phys_vmem = 64 << 20  # conservative: v7x per-TensorCore VMEM
    vmem_limit = min(vmem_limit, (phys_vmem * 3) // 4)

    cparams = pltpu.CompilerParams(
        dimension_semantics=("parallel", "parallel", "arbitrary"),
        vmem_limit_bytes=int(vmem_limit))

    x_spec = pl.BlockSpec((tm, tk), lambda i, j, k: (i, k))
    w_spec = pl.BlockSpec((tk, tn), lambda i, j, k: (k, j))
    o_spec = pl.BlockSpec((tm, tn), lambda i, j, k: (i, j))
    scratch = [pltpu.VMEM((tm, tn), jnp.float32)]
    out_shape = jax.ShapeDtypeStruct((m, out_features), out_dtype)

    if bias is not None:
        b_row = bias.reshape(1, out_features)
        b_spec = pl.BlockSpec((1, tn), lambda i, j, k: (0, j))
        out2d = pl.pallas_call(
            _linear_bias_kernel,
            out_shape=out_shape,
            grid_spec=pltpu.PrefetchScalarGridSpec(
                num_scalar_prefetch=0,
                grid=grid,
                in_specs=[x_spec, w_spec, b_spec],
                out_specs=o_spec,
                scratch_shapes=scratch),
            compiler_params=cparams,
        )(x2d, w_t, b_row)
    else:
        out2d = pl.pallas_call(
            _linear_nobias_kernel,
            out_shape=out_shape,
            grid_spec=pltpu.PrefetchScalarGridSpec(
                num_scalar_prefetch=0,
                grid=grid,
                in_specs=[x_spec, w_spec],
                out_specs=o_spec,
                scratch_shapes=scratch),
            compiler_params=cparams,
        )(x2d, w_t)

    return out2d.reshape(*lead_shape, out_features)


# ----------------------------------------------------------------------------
# Demo / correctness check
# ----------------------------------------------------------------------------
if __name__ == "__main__":
    # Small shapes consistent with the module: (batch, seq, in_features).
    batch, seq, in_features, out_features = 2, 8, 32, 32

    key = jax.random.PRNGKey(0)
    kx, kw = jax.random.split(key)

    # Parameter init mirroring the module's __init__:
    #   weight = randn(out, in) * 0.1 ; bias = zeros(out)
    weight = jax.random.normal(kw, (out_features, in_features), jnp.float32) * 0.1
    bias = jnp.zeros((out_features,), jnp.float32)
    x = jax.random.normal(kx, (batch, seq, in_features), jnp.float32)

    out = poincare_ball_linear(x, weight, bias, curvature=1.0)
    out = jax.block_until_ready(out)

    ref = x @ weight.T + bias
    assert out.shape == (batch, seq, out_features)
    assert jnp.allclose(out, ref, atol=1e-5, rtol=1e-5)

    # Extra coverage at modest sizes: ragged last M block, multi-step
    # (zero-padded) K reduction, and the bias=None kernel variant.
    k2 = jax.random.PRNGKey(1)
    ka, kb = jax.random.split(k2)
    m2, k2d, n2 = 300, 600, 384
    x2 = jax.random.normal(ka, (m2, k2d), jnp.float32)
    w2 = jax.random.normal(kb, (n2, k2d), jnp.float32) * 0.05
    out2 = jax.block_until_ready(poincare_ball_linear(x2, w2, None))
    ref2 = x2 @ w2.T
    assert out2.shape == (m2, n2)
    assert jnp.allclose(out2, ref2, atol=2e-2, rtol=2e-2)

    print("KERNEL_OK")
</pallas_src>

<mosaic_0001>
module attributes {stable_mosaic.version = 11 : i64} {
  func.func @_linear_bias_kernel(%arg0: i32, %arg1: i32, %arg2: i32, %arg3: memref<16x32xf32, #tpu.memory_space<vmem>>, %arg4: memref<32x32xf32, #tpu.memory_space<vmem>>, %arg5: memref<1x32xf32, #tpu.memory_space<vmem>>, %arg6: memref<16x32xf32, #tpu.memory_space<vmem>>, %arg7: memref<16x32xf32, #tpu.memory_space<vmem>>) attributes {dimension_semantics = [#tpu.dimension_semantics<parallel>, #tpu.dimension_semantics<parallel>, #tpu.dimension_semantics<arbitrary>], iteration_bounds = array<i64: 1, 1, 1>, scalar_prefetch = 0 : i64, scratch_operands = 1 : i64, tpu.core_type = #tpu.core_type<tc>, window_params = [{transform_indices = @transform_0, window_bounds = array<i64: 16, 32>}, {transform_indices = @transform_1, window_bounds = array<i64: 32, 32>}, {transform_indices = @transform_2, window_bounds = array<i64: 1, 32>}, {transform_indices = @transform_3, window_bounds = array<i64: 16, 32>}]} {
    %c0_i32 = arith.constant 0 : i32
    %0 = arith.cmpi eq, %arg2, %c0_i32 : i32
    %1 = arith.extui %0 : i1 to i32
    %c0_i32_0 = arith.constant 0 : i32
    %2 = arith.cmpi ne, %1, %c0_i32_0 : i32
    scf.if %2 {
      %c0_10 = arith.constant 0 : index
      %c0_11 = arith.constant 0 : index
      %12 = vector.load %arg5[%c0_10, %c0_11] : memref<1x32xf32, #tpu.memory_space<vmem>>, vector<1x32xf32>
      %13 = vector.shape_cast %12 : vector<1x32xf32> to vector<1x32xf32>
      %14 = vector.broadcast %13 : vector<1x32xf32> to vector<16x32xf32>
      %c0_12 = arith.constant 0 : index
      %c0_13 = arith.constant 0 : index
      %15 = vector.load %arg7[%c0_12, %c0_13] : memref<16x32xf32, #tpu.memory_space<vmem>>, vector<16x32xf32>
      tpu.vector_store %arg7[%c0_12, %c0_13], %14 {strides = array<i32>} : memref<16x32xf32, #tpu.memory_space<vmem>>, vector<16x32xf32>,
    } else {
    }
    %c0 = arith.constant 0 : index
    %c0_1 = arith.constant 0 : index
    %3 = vector.load %arg7[%c0, %c0_1] : memref<16x32xf32, #tpu.memory_space<vmem>>, vector<16x32xf32>
    %c0_2 = arith.constant 0 : index
    %c0_3 = arith.constant 0 : index
    %4 = vector.load %arg3[%c0_2, %c0_3] : memref<16x32xf32, #tpu.memory_space<vmem>>, vector<16x32xf32>
    %c0_4 = arith.constant 0 : index
    %c0_5 = arith.constant 0 : index
    %5 = vector.load %arg4[%c0_4, %c0_5] : memref<32x32xf32, #tpu.memory_space<vmem>>, vector<32x32xf32>
    %cst = arith.constant dense<0.000000e+00> : vector<16x32xf32>
    %6 = tpu.matmul %4, %5, %cst {dimension_numbers = #tpu.dot_dimension_numbers<[1], [0], [0], [1], [0, 0, 1, 1], [], []>} : vector<16x32xf32>, vector<32x32xf32>, vector<16x32xf32> -> vector<16x32xf32>
    %7 = arith.addf %3, %6 : vector<16x32xf32>
    %c0_6 = arith.constant 0 : index
    %c0_7 = arith.constant 0 : index
    %8 = vector.load %arg7[%c0_6, %c0_7] : memref<16x32xf32, #tpu.memory_space<vmem>>, vector<16x32xf32>
    tpu.vector_store %arg7[%c0_6, %c0_7], %7 {strides = array<i32>} : memref<16x32xf32, #tpu.memory_space<vmem>>, vector<16x32xf32>,
    %c0_i32_8 = arith.constant 0 : i32
    %9 = arith.cmpi eq, %arg2, %c0_i32_8 : i32
    %10 = arith.extui %9 : i1 to i32
    %c0_i32_9 = arith.constant 0 : i32
    %11 = arith.cmpi ne, %10, %c0_i32_9 : i32
    scf.if %11 {
      %c0_10 = arith.constant 0 : index
      %c0_11 = arith.constant 0 : index
      %12 = vector.load %arg7[%c0_10, %c0_11] : memref<16x32xf32, #tpu.memory_space<vmem>>, vector<16x32xf32>
      %c0_12 = arith.constant 0 : index
      %c0_13 = arith.constant 0 : index
      %13 = vector.load %arg6[%c0_12, %c0_13] : memref<16x32xf32, #tpu.memory_space<vmem>>, vector<16x32xf32>
      tpu.vector_store %arg6[%c0_12, %c0_13], %12 {strides = array<i32>} : memref<16x32xf32, #tpu.memory_space<vmem>>, vector<16x32xf32>,
    } else {
    }
    return
  }
  func.func @transform_0(%arg0: i32, %arg1: i32, %arg2: i32) -> (i32, i32) {
    %c0_i32 = arith.constant 0 : i32
    return %arg0, %arg2 : i32, i32
  }
  func.func @transform_1(%arg0: i32, %arg1: i32, %arg2: i32) -> (i32, i32) {
    %c0_i32 = arith.constant 0 : i32
    return %arg2, %arg1 : i32, i32
  }
  func.func @transform_2(%arg0: i32, %arg1: i32, %arg2: i32) -> (i32, i32) {
    %c0_i32 = arith.constant 0 : i32
    %c0_i32_0 = arith.constant 0 : i32
    return %c0_i32, %arg1 : i32, i32
  }
  func.func @transform_3(%arg0: i32, %arg1: i32, %arg2: i32) -> (i32, i32) {
    %c0_i32 = arith.constant 0 : i32
    return %arg0, %arg1 : i32, i32
  }
}

</mosaic_0001>

<bundles_post_ra>
// kernel: tpu_custom_call.1
= control target key start
LH: loop header
LB: loop body
LE: loop exit
PB: predicated region body
PF: predicated region fallthrough
CT: control target
= control target key end

     0   :  { %8 = vsyncpa [#allocation4], 0  ;;  %s362_s0 = inlined_call_operand.hbm [shape: f32[16,32], index: 0, kind: input, shape index: {}]   ;;  %s363_s1 = inlined_call_operand.hbm [shape: f32[32,32], index: 1, kind: input, shape index: {}]   ;;  %s364_s2 = inlined_call_operand.vmem [shape: f32[1,32], index: 2, kind: input, shape index: {}]   ;;  %s365_s3 = inlined_call_operand.hbm [shape: f32[16,32], index: 3, kind: output, shape index: {}]  }
   0x1   :  { %9 = vsyncpa [#allocation7], 0 }
   0x2   :  { %10 = vsyncpa [#allocation5], 0  ;;  %s281_s12 = smov [#allocation3]   ;;  %s209_s16 = scalar_lea.hbm %s362_s0, 256 }
   0x3   :  { %s16_s13 = sshll.u32 %s281_s12, 4  ;;  %p210_p0 = scmp.ne.s32.totalorder %s362_s0, %s209_s16  ;;  %s17_s13 = int_to_ptr.vmem [resolvable:$true] %s16_s13 }
   0x4   :  { %p213_p1 = scmp.lt.u32.totalorder %s209_s16, %s362_s0 }
   0x6   :  { %p215_p2 = pnand %p213_p1, %p210_p0 }
   0x8   :  { %218 = shalt.err (!%p215_p2)
}
   0x9   :  { %s219_s21 = scalar_lea.vmem %s17_s13, 256  ;;  %p224_p4 = scmp.lt.s32.totalorder %s17_s13, %s17_s13 }
   0xa   :  { %p220_p3 = scmp.ne.s32.totalorder %s17_s13, %s219_s21  ;;  %p225_p5 = scmp.lt.s32.totalorder %s219_s21, %s219_s21 }
   0xc   :  { %p226_p6 = por %p225_p5, %p224_p4 }
   0xe   :  { %p227_p7 = pnand %p226_p6, %p220_p3 }
  0x10   :  { %230 = shalt.err (!%p227_p7)
}
  0x11   :  { %s282_s22 = smov 128   ;;  %s283_s23 = smov 8  }
  0x12   :  { %22 = dma.hbm_to_vmem [thread:$0]  %s362_s0, 256, %s17_s13, [#allocation4], %s282_s22, %s282_s22, %s283_s23  }
  0x13   :  { %s284_s26 = smov [#allocation6]   ;;  %s231_s30 = scalar_lea.hbm %s363_s1, 512 }
  0x14   :  { %s28_s27 = sshll.u32 %s284_s26, 4  ;;  %p232_p8 = scmp.ne.s32.totalorder %s363_s1, %s231_s30  ;;  %s29_s27 = int_to_ptr.vmem [resolvable:$true] %s28_s27 }
  0x15   :  { %p235_p9 = scmp.lt.u32.totalorder %s231_s30, %s363_s1 }
  0x17   :  { %p237_p10 = pnand %p235_p9, %p232_p8 }
  0x19   :  { %240 = shalt.err (!%p237_p10)
}
  0x1a   :  { %s241_s8 = scalar_lea.vmem %s29_s27, 512  ;;  %p246_p12 = scmp.lt.s32.totalorder %s29_s27, %s29_s27 }
  0x1b   :  { %p242_p11 = scmp.ne.s32.totalorder %s29_s27, %s241_s8  ;;  %p247_p13 = scmp.lt.s32.totalorder %s241_s8, %s241_s8 }
  0x1d   :  { %p248_p0 = por %p247_p13, %p246_p12 }
  0x1f   :  { %p249_p1 = pnand %p248_p0, %p242_p11 }
  0x21   :  { %252 = shalt.err (!%p249_p1)
}
  0x22   :  { %34 = dma.hbm_to_vmem [thread:$0]  %s363_s1, 512, %s29_s27, [#allocation7], %s282_s22, %s282_s22, %s283_s23  }
  0x23   :  { %275 = dma.done.wait [#allocation4], 256  }
  0x24   :  { %276 = vsyncadd [#allocation4], 4294967040 }
  0x25   :  { %277 = dma.done.wait [#allocation7], 512  }
  0x26   :  { %278 = vsyncadd [#allocation7], 4294966784  ;;  %vm54_vm0 = vcmask 261120   ;;  %v61_v0 = vld [vmem:[#allocation6] sm:$0xff]  ;;  %v62_v1 = vld [vmem:[#allocation6 + $0x8] sm:$0xff]  ;;  %s285_s1 = smov [#allocation8]  }
  0x27   :  { %v63_v2 = vld [vmem:[#allocation6 + $0x10] sm:$0xff]  ;;  %v196_v3 = vpack.c.bf16 %v62_v1, %v61_v0  ;;  %v64_v4 = vld [vmem:[#allocation6 + $0x18] sm:$0xff]  ;;  %v176_v7 = vld [vmem:[%s364_s2] ss:$0 sm:$0xff]  ;;  %s163_s2 = sshll.u32 %s285_s1, 4  ;;  %s164_s2 = int_to_ptr.vmem [resolvable:$true] %s163_s2 }
  0x28   :  { %v59_v5 = vld [vmem:[#allocation3] sm:$0xff]  ;;  %v200_v6 = vpack.c.bf16 %v64_v4, %v63_v2  ;;  %56 = vst.msk [vmem:[#allocation2 + $0x8] sm:$0xff] %vm54_vm0, %v176_v7  ;;  %55 = vst.msk [vmem:[#allocation2] sm:$0xff] %vm54_vm0, %v176_v7  ;;  %v60_v8 = vld [vmem:[#allocation3 + $0x8] sm:$0xff]  ;;  %s253_s12 = scalar_lea.vmem %s164_s2, 256  ;;  %p258_p3 = scmp.lt.s32.totalorder %s164_s2, %s164_s2 }
  0x29   :  { %193 = vmatprep.mubr.msk.f32.mxu0 %vm54_vm0, %v59_v5  ;;  %197 = vmatprep.subr.bf16.mxu0 %v196_v3  ;;  %p254_p2 = scmp.ne.s32.totalorder %s164_s2, %s253_s12  ;;  %p259_p4 = scmp.lt.s32.totalorder %s253_s12, %s253_s12 }
  0x2a   :  { %199 = vmatpush3.bf16.msra.mxu0 %v196_v3 }
  0x2b   :  { %201 = vmatprep.subr.bf16.mxu0 %v200_v6  ;;  %p260_p5 = por %p259_p4, %p258_p3 }
  0x2d   :  { %p261_p6 = pnand %p260_p5, %p254_p2 }
  0x2e   :  { %203 = vmatpush3.bf16.msra.mxu0 %v200_v6 }
  0x2f   :  { %v58_v9 = vld [vmem:[#allocation2 + $0x8] sm:$0xff]  ;;  %v57_v10 = vld [vmem:[#allocation2] sm:$0xff] }
  0x31   :  { %194 = vmatmul.mubr.msk.f32.vlgmr.msra.gmra.mrb[0].mxu0 %vm54_vm0, %v60_v8 }
 0x104   :  { %v195_v11 = vpop.f32.mrb[0].mxu0 }
 0x105   :  { %v148_v12 = vadd.f32 %v195_v11, %v58_v9  ;;  %v138_v13 = vpop.f32.mrb[1].mxu0 }
 0x106   :  { %v147_v14 = vadd.f32 %v138_v13, %v57_v10 }
 0x107   :  { %150 = vst.msk [vmem:[#allocation2 + $0x8] sm:$0xff] %vm54_vm0, %v148_v12 }
 0x108   :  { %149 = vst.msk [vmem:[#allocation2] sm:$0xff] %vm54_vm0, %v147_v14 }
 0x10e   :  { %v155_v15 = vld [vmem:[#allocation2 + $0x8] sm:$0xff] }
 0x10f   :  { %v154_v16 = vld [vmem:[#allocation2] sm:$0xff]  ;;  %157 = vst.msk [vmem:[#allocation8 + $0x8] sm:$0xff] %vm54_vm0, %v155_v15 }
 0x110   :  { %156 = vst.msk [vmem:[#allocation8] sm:$0xff] %vm54_vm0, %v154_v16 }
 0x111   :  { %264 = shalt.err (!%p261_p6)
}
 0x112   :  { %s265_s15 = scalar_lea.hbm %s365_s3, 256 }
 0x113   :  { %p266_p7 = scmp.ne.s32.totalorder %s365_s3, %s265_s15  ;;  %p269_p8 = scmp.lt.u32.totalorder %s265_s15, %s365_s3 }
 0x115   :  { %p271_p9 = pnand %p269_p8, %p266_p7 }
 0x117   :  { %274 = shalt.err (!%p271_p9)
}
 0x118   :  { %169 = dma.vmem_to_hbm [thread:$0]  %s164_s2, 256, %s365_s3, [#allocation5], %s282_s22, %s282_s22, %s283_s23  }
 0x119   :  { %279 = dma.done.wait [#allocation5], 256  }
 0x11a   :  { %280 = vsyncadd [#allocation5], 4294967040 }
 0x11b   :  { %173 = vsyncpa [#allocation4], 1 }
 0x11c   :  { %174 = vsyncpa [#allocation7], 1 }
 0x11d   :  { %175 = vsyncpa [#allocation5], 1 }

</bundles_post_ra>
